<compile_context>
chip_gen: v7x
topology: tpu7x:2x2x1
jax: 0.10.0
libtpu: 0.0.40
codegen_flags: <defaults>
</compile_context>

<pallas_src>
import jax
import jax.numpy as jnp
from jax.experimental import pallas as pl
from jax.experimental.pallas import tpu as pltpu


def _shuffle_copy_kernel(x_ref, o_ref):
    # Pure copy: the channel shuffle happens in the HBM<->VMEM DMA addressing
    # (input/output BlockSpec index_maps), not in compute.  In/out blocks hold
    # the same elements in the same order; only a size-1 axis moves.
    o_ref[...] = x_ref[...].reshape(o_ref.shape)


def _pick_lanes(hw):
    """Smallest divisor of hw that is a multiple of 128 (lane-dense tiles).

    Falls back to hw itself (full-dim block, always legal) if none exists.
    """
    for d in range(128, hw + 1, 128):
        if hw % d == 0:
            return d
    return hw


def _choose_tiling(cpg, s, lanes, itemsize, max_block_bytes):
    """Pick (B_I channels per block, S_T sublane rows per block)."""
    # Sublane packing multiple: f32 -> 8, bf16 -> 16, int8 -> 32.
    sub = 8 * max(1, 4 // max(1, itemsize))
    slab_bytes = s * lanes * itemsize  # one channel's full spatial slab
    if slab_bytes <= max_block_bytes:
        # Coarsen over the channel (cpg) axis first: biggest lever, cuts grid
        # steps by up to C/g and makes each DMA MB-scale.
        s_t = s
        budget_ch = max(1, max_block_bytes // slab_bytes)
        b_i = 1
        for d in range(1, cpg + 1):
            if cpg % d == 0 and d <= budget_ch:
                b_i = d
    else:
        # One channel's slab is too big for a block: tile the sublane axis
        # with an aligned S_T (multiple of packing factor, or the full dim).
        b_i = 1
        budget_rows = max(1, max_block_bytes // (lanes * itemsize))
        cands = [d for d in range(1, s + 1)
                 if s % d == 0 and (d % sub == 0 or d == s)]
        under = [d for d in cands if d <= budget_rows]
        s_t = max(under) if under else min(cands)
    return b_i, s_t


def channel_shuffle(x, groups, max_block_bytes=4 << 20):
    """Pallas TPU implementation of ChannelShuffle.forward for NCHW input."""
    N, C, H, W = x.shape
    g = groups
    assert C % g == 0, (
        "Incompatible group size {} for input channel {}".format(g, C))
    cpg = C // g
    HW = H * W
    itemsize = x.dtype.itemsize

    lanes = _pick_lanes(HW)
    S = HW // lanes
    B_I, S_T = _choose_tiling(cpg, S, lanes, itemsize, max_block_bytes)

    # Grouped input view (N, g, cpg, S, L); output view is the shuffled layout
    # (N, cpg, g, S, L), which reshapes back to (N, C, H, W) with out channel
    # c = i*g + j.  Both reshapes are free row-major views.
    x5 = x.reshape(N, g, cpg, S, lanes)

    in_block = (1, 1, B_I, S_T, lanes)
    out_block = (1, B_I, 1, S_T, lanes)
    grid = (N, cpg // B_I, g, S // S_T)

    block_bytes = B_I * S_T * lanes * itemsize
    # 2 input + 2 output pipeline buffers, plus headroom.
    vmem_limit = max(16 << 20, 4 * block_bytes + (4 << 20))

    out5 = pl.pallas_call(
        _shuffle_copy_kernel,
        out_shape=jax.ShapeDtypeStruct((N, cpg, g, S, lanes), x.dtype),
        grid_spec=pltpu.PrefetchScalarGridSpec(
            num_scalar_prefetch=0,
            grid=grid,
            in_specs=[
                # Output channel (i, j) sources group j, slot i; a run of B_I
                # slots is contiguous in the input.
                pl.BlockSpec(in_block, lambda n, ib, j, s: (n, j, ib, s, 0)),
            ],
            out_specs=pl.BlockSpec(out_block,
                                   lambda n, ib, j, s: (n, ib, j, s, 0)),
        ),
        compiler_params=pltpu.CompilerParams(
            dimension_semantics=("parallel", "parallel", "parallel", "parallel"),
            vmem_limit_bytes=vmem_limit,
        ),
    )(x5)

    return out5.reshape(N, C, H, W)


def _reference_channel_shuffle(x, groups):
    # Pure-JAX reference mirroring the PyTorch view/permute/view chain.
    N, C, H, W = x.shape
    g = groups
    return (x.reshape(N, g, C // g, H, W)
             .transpose(0, 2, 1, 3, 4)
             .reshape(N, C, H, W))


def _check(x, groups, **kwargs):
    out = jax.block_until_ready(channel_shuffle(x, groups, **kwargs))
    ref = _reference_channel_shuffle(x, groups)
    assert out.shape == x.shape
    assert out.dtype == x.dtype
    assert jnp.array_equal(out, ref), "Pallas channel shuffle mismatch vs reference"


if __name__ == "__main__":
    key = jax.random.PRNGKey(0)
    k1, k2, k3, k4, k5 = jax.random.split(key, 5)

    # Primary test: N=2, C=4, H=W=16, groups=2 (HW=256 -> dense (2,128) tiles,
    # full-cpg channel coarsening).
    x = jax.random.normal(k1, (2, 4, 16, 16), dtype=jnp.float32)
    _check(x, groups=2)

    # Spatial size with no multiple-of-128 divisor (lane fallback, HW=64).
    x2 = jax.random.normal(k2, (1, 6, 8, 8), dtype=jnp.float32)
    _check(x2, groups=3)

    # FBNet-like ragged spatial (28x28=784, no 128 divisor) in bf16.
    x3 = jax.random.normal(k3, (2, 16, 28, 28), dtype=jnp.bfloat16)
    _check(x3, groups=4)

    # HW=1024 -> (8,128) dense tiles, coarsened over cpg=4.
    x4 = jax.random.normal(k4, (1, 8, 32, 32), dtype=jnp.float32)
    _check(x4, groups=2)

    # Tiny block cap to exercise the sublane-tiling (S_T < S) fallback path.
    x5 = jax.random.normal(k5, (1, 8, 64, 64), dtype=jnp.float32)
    _check(x5, groups=2, max_block_bytes=8192)

    print("KERNEL_OK")
</pallas_src>

<mosaic_0001>
module attributes {stable_mosaic.version = 11 : i64} {
  func.func @_shuffle_copy_kernel(%arg0: i32, %arg1: i32, %arg2: i32, %arg3: i32, %arg4: memref<1x1x2x2x128xf32, #tpu.memory_space<vmem>>, %arg5: memref<1x2x1x2x128xf32, #tpu.memory_space<vmem>>) attributes {dimension_semantics = [#tpu.dimension_semantics<parallel>, #tpu.dimension_semantics<parallel>, #tpu.dimension_semantics<parallel>, #tpu.dimension_semantics<parallel>], iteration_bounds = array<i64: 2, 1, 2, 1>, scalar_prefetch = 0 : i64, scratch_operands = 0 : i64, tpu.core_type = #tpu.core_type<tc>, window_params = [{transform_indices = @transform_0, window_bounds = array<i64: 1, 1, 2, 2, 128>}, {transform_indices = @transform_1, window_bounds = array<i64: 1, 2, 1, 2, 128>}]} {
    %c0 = arith.constant 0 : index
    %c0_0 = arith.constant 0 : index
    %c0_1 = arith.constant 0 : index
    %c0_2 = arith.constant 0 : index
    %c0_3 = arith.constant 0 : index
    %0 = vector.load %arg4[%c0, %c0_0, %c0_1, %c0_2, %c0_3] : memref<1x1x2x2x128xf32, #tpu.memory_space<vmem>>, vector<1x1x2x2x128xf32>
    %1 = vector.shape_cast %0 : vector<1x1x2x2x128xf32> to vector<1x2x1x2x128xf32>
    %c0_4 = arith.constant 0 : index
    %c0_5 = arith.constant 0 : index
    %c0_6 = arith.constant 0 : index
    %c0_7 = arith.constant 0 : index
    %c0_8 = arith.constant 0 : index
    %2 = vector.load %arg5[%c0_4, %c0_5, %c0_6, %c0_7, %c0_8] : memref<1x2x1x2x128xf32, #tpu.memory_space<vmem>>, vector<1x2x1x2x128xf32>
    tpu.vector_store %arg5[%c0_4, %c0_5, %c0_6, %c0_7, %c0_8], %1 {strides = array<i32>} : memref<1x2x1x2x128xf32, #tpu.memory_space<vmem>>, vector<1x2x1x2x128xf32>,
    return
  }
  func.func @transform_0(%arg0: i32, %arg1: i32, %arg2: i32, %arg3: i32) -> (i32, i32, i32, i32, i32) {
    %c0_i32 = arith.constant 0 : i32
    %c0_i32_0 = arith.constant 0 : i32
    return %arg0, %arg2, %arg1, %arg3, %c0_i32 : i32, i32, i32, i32, i32
  }
  func.func @transform_1(%arg0: i32, %arg1: i32, %arg2: i32, %arg3: i32) -> (i32, i32, i32, i32, i32) {
    %c0_i32 = arith.constant 0 : i32
    %c0_i32_0 = arith.constant 0 : i32
    return %arg0, %arg1, %arg2, %arg3, %c0_i32 : i32, i32, i32, i32, i32
  }
}

</mosaic_0001>

<bundles_post_ra>
// kernel: tpu_custom_call.1
= control target key start
LH: loop header
LB: loop body
LE: loop exit
PB: predicated region body
PF: predicated region fallthrough
CT: control target
= control target key end

     0   :  { %6 = vsyncpa [#allocation3], 0  ;;  %s745_s0 = inlined_call_operand.hbm [shape: f32[2,2,2,2,128], index: 0, kind: input, shape index: {}]   ;;  %s746_s1 = inlined_call_operand.hbm [shape: f32[2,2,2,2,128], index: 1, kind: output, shape index: {}]  }
   0x1   :  { %8 = vsyncpa [#allocation3 + $0x1], 0 }
   0x2   :  { %9 = vsyncpa [#allocation4], 0 }
   0x3   :  { %11 = vsyncpa [#allocation4 + $0x1], 0  ;;  %s550_s6 = smov 0   ;;  %s552_s7 = smov 0  }
   0x4   :  { %s554_s8 = smov 0   ;;  %s556_s9 = smov 0  }
   0x5   :  { %s558_s10 = smov 0   ;;  %s560_s11 = smov 0  }
   0x6   :  { %s562_s12 = smov 0   ;;  %s564_s13 = smov 0  }
   0x7 LB: > { %s304_s14 = sadd.s32 4294967295, %s531_s13   ;;  %s305_s15 = sadd.s32 4294967294, %s531_s13   ;;  %s531_s13 = sphi %s564_s13, %s17_s13   ;;  %s527_s12 = sphi %s562_s12, %s761_s12   ;;  %s523_s11 = sphi %s560_s11, %s760_s11   ;;  %s519_s10 = sphi %s558_s10, %s759_s10   ;;  %s515_s9 = sphi %s556_s9, %s758_s9   ;;  %s511_s8 = sphi %s554_s8, %s757_s8   ;;  %s507_s7 = sphi %s552_s7, %s756_s7   ;;  %s503_s6 = sphi %s550_s6, %s755_s6  }
   0x8   : > { %s35_s16 = sadd.s32 1, %s523_s11  ;;  %s43_s17 = sadd.s32 1, %s527_s12 }
   0x9   : > { %p37_p0 = scmp.ge.s32.totalorder %s35_s16, 2  ;;  %s56_s18 = sadd.s32 1, %s511_s8 }
   0xa   : > { %p63_p1 = scmp.ne.s32.totalorder %s511_s8, %s507_s7  ;;  %p64_p2 = scmp.eq.s32.totalorder %s531_s13, 0 }
   0xb   : > { %s763_s16 = smov (%p37_p0, %s35_s16), 0  ;;  %s765_s17 = smov (!%p37_p0, %s43_s17), %s527_s12 }
   0xc   : > { %s48_s19 = ssub.s32 %s523_s11, %s763_s16  ;;  %p603_p3 = por %p64_p2, %p63_p1 }
   0xd   : > { %p45_p4 = scmp.ge.s32.totalorder %s765_s17, 2  ;;  %p69_p5 = scmp.ne.s32.totalorder %s507_s7, %s503_s6 }
   0xe   : > { %p70_p6 = scmp.eq.s32.totalorder %s304_s14, 0  ;;  %p99_p7 = scmp.eq.s32.totalorder %s304_s14, 3 }
   0xf   : > { %s767_s17 = smov (%p45_p4, %s765_s17), 0  ;;  %p105_p10 = scmp.eq.s32.totalorder %s305_s15, 3 }
  0x10   : > { %p611_p8 = por %p70_p6, %p69_p5  ;;  %p615_p9 = por %p99_p7, %p63_p1 }
  0x11   : > { %s47_s23 = ssub.s32 %s527_s12, %s767_s17  ;;  %p621_p12 = por %p105_p10, %p69_p5 }
  0x12   : > { %s750_s22 = scalar_select %p615_p9, 1, 0 }
  0x13   : > { %s49_s24 = sor.u32 %s48_s19, %s47_s23  ;;  %p332_p13 = scmp.lt.s32.totalorder %s531_s13, 4 }
  0x14   : > { %p54_p11 = scmp.eq.s32.totalorder %s49_s24, 0  ;;  %s125_s26 = sand.u32 1, %s511_s8  }
  0x15   : > { %s751_s25 = scalar_select %p621_p12, 1, 0 }
  0x16   : > { %s628_s27 = scalar_select %p54_p11, %s511_s8, %s56_s18  }
  0x17   : > { %s308_s28 = sshll.u32 %s125_s26, 2  ;;  %s309_s29 = sshll.u32 %s523_s11, 1 }
  0x18   : > { %s310_s30 = sshll.u32 %s527_s12, 2  ;;  %s129_s2 = scalar_lea.vmem [#allocation2], %s308_s28 }
  0x19   : > { %s141_s3 = sshll.u32 %s129_s2, 4  ;;  %s138_s4 = sadd.s32 %s310_s30, %s309_s29  ;;  %s632_s3 = int_to_ptr.vmem [resolvable:$true] %s141_s3 }
  0x1a   : > { %s311_s5 = sshll.u32 %s138_s4, 5  ;;  %p636_p0 = pnand %p332_p13, %p603_p3 }
  0x1b   : > { %s643_s18 = scalar_lea.hbm %s745_s0, %s311_s5  ;;  %s645_s23 = scalar_lea.sflag [#allocation3], %s125_s26 }
  0x1c   : > { %s403_s24 = scalar_lea.hbm %s643_s18, 64  ;;  %p405_p2 = pneg %p636_p0 }
  0x1d   : > { %p404_p1 = scmp.ne.s32.totalorder %s643_s18, %s403_s24  ;;  %s408_s29 = scalar_lea.hbm %s745_s0, 256 }
  0x1e   : > { %p409_p5 = scmp.lt.u32.totalorder %s643_s18, %s745_s0  ;;  %p410_p6 = scmp.lt.u32.totalorder %s408_s29, %s403_s24 }
  0x1f   : > { %p406_p3 = pnand %p405_p2, %p404_p1  ;;  %p412_p10 = scmp.lt.u32.totalorder %s403_s24, %s643_s18 }
  0x20   : > { %p411_p7 = por %p410_p6, %p409_p5 }
  0x21   : > { %p407_p4 = pneg %p406_p3 }
  0x22   : > { %p413_p11 = por %p412_p10, %p411_p7 }
  0x24   : > { %p414_p13 = pnand %p413_p11, %p407_p4 }
  0x26   : > { %417 = shalt.err (!%p414_p13)
}
  0x27   : > { %s418_s26 = scalar_lea.vmem %s632_s3, 64  ;;  %s533_s4 = smov [#allocation2]  }
  0x28   : > { %p419_p1 = scmp.ne.s32.totalorder %s632_s3, %s418_s26  ;;  %s423_s5 = sshll.u32 %s533_s4, 4  ;;  %s424_s5 = int_to_ptr.vmem [resolvable:$false] %s423_s5 }
  0x29   : > { %s425_s15 = scalar_lea.vmem %s424_s5, 128  ;;  %p426_p9 = scmp.lt.s32.totalorder %s632_s3, %s424_s5 }
  0x2a   : > { %p421_p3 = pnand %p419_p1, %p405_p2  ;;  %p427_p5 = scmp.lt.s32.totalorder %s425_s15, %s418_s26 }
  0x2c   : > { %p422_p12 = pneg %p421_p3  ;;  %p428_p6 = por %p427_p5, %p426_p9 }
  0x2e   : > { %p429_p7 = pnand %p428_p6, %p422_p12 }
  0x30   : > { %432 = shalt.err (!%p429_p7)
}
  0x31   : > { %s534_s19 = smov 32   ;;  %s535_s24 = smov 2  }
  0x32   : > { %327 = dma.hbm_to_vmem [thread:$0]  (!%p636_p0), %s643_s18, 64, %s632_s3, %s645_s23, %s534_s19, %s534_s19, %s535_s24  }
  0x33   : > { %p312_p2 = scmp.ge.s32.totalorder %s531_s13, 1  ;;  %p149_p4 = scmp.lt.s32.totalorder %s531_s13, 5 }
  0x35   : > { %p150_p10 = pnand %p312_p2, %p149_p4 }
  0x36   : > { %s676_s20 = sand.u32 (!%p150_p10), 1, %s507_s7  }
  0x37   : > { %153 = sbr.rel (%p150_p10) target bundleno = 92 (0x5c), region = 24  ;;  %s313_s28 = sshll.u32 (!%p150_p10), %s676_s20, 2 }
  0x38   : > { %s156_s29 = scalar_lea.sflag (!%p150_p10), [#allocation3], %s676_s20  ;;  %s159_s30 = scalar_lea.vmem (!%p150_p10), [#allocation2], %s313_s28 }
  0x3e   : > { %494 = dma.done.wait (%p611_p8), %s156_s29, 64  }
  0x3f   : > { %496 = vsyncadd (%p611_p8), %s156_s29, 4294967232  ;;  %s177_s3 = scalar_lea.vmem [#allocation5], %s313_s28  ;;  %s316_s18 = sshll.u32 %s519_s10, 2  ;;  %v180_v0 = vld [vmem:[%s159_s30] sm:$0xf]  }
  0x40   : > { %s203_s14 = sshll.u32 %s177_s3, 4  ;;  %s200_s23 = sadd.s32 %s515_s9, %s316_s18  ;;  %182 = vst [vmem:[%s177_s3] sm:$0xf] %v180_v0   ;;  %s686_s14 = int_to_ptr.vmem [resolvable:$true] %s203_s14 }
  0x41   : > { %s317_s2 = sshll.u32 %s200_s23, 5  ;;  %s185_s21 = scalar_lea.sflag [#allocation4], %s676_s20 }
  0x42   : > { %s691_s5 = scalar_lea.hbm %s746_s1, %s317_s2  ;;  %s433_s15 = scalar_lea.vmem %s686_s14, 64 }
  0x43   : > { %p434_p8 = scmp.ne.s32.totalorder %s686_s14, %s433_s15  ;;  %p753_p9 = scmp.ne.s32.totalorder %s750_s22, 0 }
  0x44   : > { %s536_s9 = smov [#allocation5]  }
  0x45   : > { %p435_p12 = pnand %p434_p8, %p753_p9  ;;  %s437_s10 = sshll.u32 %s536_s9, 4  ;;  %s438_s10 = int_to_ptr.vmem [resolvable:$false] %s437_s10 }
  0x46   : > { %s439_s19 = scalar_lea.vmem %s438_s10, 128  ;;  %p440_p11 = scmp.lt.s32.totalorder %s686_s14, %s438_s10 }
  0x47   : > { %p436_p0 = pneg %p435_p12  ;;  %p441_p13 = scmp.lt.s32.totalorder %s439_s19, %s433_s15 }
  0x49   : > { %p442_p1 = por %p441_p13, %p440_p11 }
  0x4b   : > { %p443_p3 = pnand %p442_p1, %p436_p0 }
  0x4d   : > { %446 = shalt.err (!%p443_p3)
}
  0x4e   : > { %s447_s24 = scalar_lea.hbm %s691_s5, 64  ;;  %s451_s30 = scalar_lea.hbm %s746_s1, 256 }
  0x4f   : > { %p448_p5 = scmp.ne.s32.totalorder %s691_s5, %s447_s24  ;;  %p452_p2 = scmp.lt.u32.totalorder %s691_s5, %s746_s1 }
  0x50   : > { %p453_p4 = scmp.lt.u32.totalorder %s451_s30, %s447_s24  ;;  %p455_p8 = scmp.lt.u32.totalorder %s447_s24, %s691_s5 }
  0x51   : > { %p449_p6 = pnand %p448_p5, %p753_p9 }
  0x52   : > { %p454_p10 = por %p453_p4, %p452_p2 }
  0x53   : > { %p450_p7 = pneg %p449_p6 }
  0x54   : > { %p456_p12 = por %p455_p8, %p454_p10 }
  0x56   : > { %p457_p0 = pnand %p456_p12, %p450_p7 }
  0x58   : > { %460 = shalt.err (!%p457_p0)
}
  0x59   : > { %s537_s23 = smov 32   ;;  %s538_s2 = smov 64  }
  0x5a   : > { %s539_s26 = smov 2  }
  0x5b   : > { %322 = dma.vmem_to_hbm [thread:$0]  (%p753_p9), %s686_s14, 64, %s691_s5, %s185_s21, %s537_s23, %s538_s2, %s539_s26  }
  0x5c PF: > { %p333_p11 = scmp.ge.s32.totalorder %s531_s13, 2  ;;  %s218_s4 = sand.u32 1, %s503_s6  }
  0x5d   : > { %p754_p13 = scmp.ne.s32.totalorder %s751_s25, 0  ;;  %s219_s15 = scalar_lea.sflag [#allocation4], %s218_s4 }
  0x5f   : > { %p329_p1 = pnand %p333_p11, %p754_p13 }
  0x61   : > { %498 = dma.done.wait (!%p329_p1), %s219_s15, 64  }
  0x62   : > { %500 = vsyncadd (!%p329_p1), %s219_s15, 4294967232  ;;  %s17_s13 = sadd.s32 1, %s531_s13   ;;  %s755_s6 = smov %s507_s7 }
  0x63   : > { %p14_p3 = scmp.ge.s32.totalorder %s17_s13, 6   ;;  %s756_s7 = smov %s511_s8 }
  0x64   : > { %s757_s8 = smov %s628_s27  ;;  %s758_s9 = smov %s523_s11 }
  0x65   : > { %s759_s10 = smov %s527_s12  ;;  %s760_s11 = smov %s763_s16 }
  0x66   : > { %s761_s12 = smov %s767_s17  ;;  %16 = sbr.rel (!%p14_p3) target bundleno = 7 (0x7), region = 69 }
  0x6d   :  { %224 = vsyncpa [#allocation3], 1 }
  0x6e   :  { %226 = vsyncpa [#allocation3 + $0x1], 1 }
  0x6f   :  { %227 = vsyncpa [#allocation4], 1 }
  0x70   :  { %229 = vsyncpa [#allocation4 + $0x1], 1 }

</bundles_post_ra>
